<compile_context>
chip_gen: v7x
topology: tpu7x:2x2x1
jax: 0.10.0
libtpu: 0.0.40
codegen_flags: <defaults>
</compile_context>

<pallas_src>
import jax
import jax.numpy as jnp
from jax.experimental import pallas as pl
from jax.experimental.pallas import tpu as pltpu


def _round_up(n, m):
    return ((n + m - 1) // m) * m


def _cdiv(a, b):
    return -(-a // b)


def _qnet_kernel(x_ref, w1_ref, b1_ref, w2_ref, b2_ref, w3_ref, b3_ref, o_ref):
    # Layer 1: single fused matmul over the pre-concatenated [s, a] tile.
    # bf16 operands, f32 MXU accumulation.
    h1 = jnp.dot(x_ref[...], w1_ref[...], preferred_element_type=jnp.float32)
    h1 = jnp.maximum(h1 + b1_ref[...], 0.0)

    # Layer 2.
    h2 = jnp.dot(h1.astype(jnp.bfloat16), w2_ref[...],
                 preferred_element_type=jnp.float32)
    h2 = jnp.maximum(h2 + b2_ref[...], 0.0)

    # Layer 3 (256 -> 1): VPU multiply + XLU lane reduction; keeps the MXU free
    # and avoids a padded (256, 1) weight tile.
    o = jnp.sum(h2 * w3_ref[...], axis=-1, keepdims=True) + b3_ref[...]
    o_ref[...] = o.astype(o_ref.dtype)


def _choose_tiling(B, block_b):
    """Tile the batch with at most 15 padded rows; >=2 tiles for big batches."""
    num_tiles = max(1, _cdiv(B, block_b))
    # v7x megacore: make sure both TensorCores get work for medium/large B.
    if num_tiles == 1 and B > 256:
        num_tiles = 2
    TB = _round_up(_cdiv(B, num_tiles), 16)   # bf16 sublane packing: mult of 16
    Bp = num_tiles * TB
    return TB, Bp


def q_value_net_forward(s, a, params, block_b=1024):
    """Pallas forward for q_valueNet. s: (B, s_dim), a: (B, a_dim) -> (B, 1)."""
    w1, b1, w2, b2, w3, b3 = params
    B, s_dim = s.shape
    a_dim = a.shape[1]
    in_dim = s_dim + a_dim
    H = w2.shape[0]
    assert w1.shape == (in_dim, H), w1.shape
    assert w3.shape == (H, 1), ("w3 must be (hidden, 1)", w3.shape)

    TB, Bp = _choose_tiling(B, block_b)

    # Fuse the concat in the wrapper and cast to bf16 before padding:
    # one streamed bf16 input (48 B/row for the default dims).
    x = jnp.concatenate([s, a], axis=1).astype(jnp.bfloat16)
    if Bp != B:
        x = jnp.pad(x, ((0, Bp - B), (0, 0)))

    # Weights: bf16 operands for the MXU layers, f32 for biases / final VPU row.
    w1_b = w1.astype(jnp.bfloat16)                    # (in_dim, H)
    w2_b = w2.astype(jnp.bfloat16)                    # (H, H)
    b1_2d = b1.reshape(1, H).astype(jnp.float32)
    b2_2d = b2.reshape(1, H).astype(jnp.float32)
    w3_row = w3.reshape(1, H).astype(jnp.float32)     # (1, H)
    b3_2d = b3.reshape(1, 1).astype(jnp.float32)

    grid = (Bp // TB,)
    resident = lambda shape: pl.BlockSpec(shape, lambda i: (0, 0))

    out = pl.pallas_call(
        _qnet_kernel,
        out_shape=jax.ShapeDtypeStruct((Bp, 1), jnp.float32),
        grid=grid,
        in_specs=[
            pl.BlockSpec((TB, in_dim), lambda i: (i, 0)),  # streamed per tile
            resident(w1_b.shape),                          # resident in VMEM
            resident(b1_2d.shape),
            resident(w2_b.shape),
            resident(b2_2d.shape),
            resident(w3_row.shape),
            resident(b3_2d.shape),
        ],
        out_specs=pl.BlockSpec((TB, 1), lambda i: (i, 0)),
        compiler_params=pltpu.CompilerParams(
            dimension_semantics=("parallel",),
        ),
    )(x, w1_b, b1_2d, w2_b, b2_2d, w3_row, b3_2d)
    return out[:B]


def init_params(key, s_dim, a_dim, hidden=256):
    """Deterministic init mirroring the PyTorch module's __init__.

    nn.Linear default: U(-1/sqrt(fan_in), 1/sqrt(fan_in)) for weight & bias.
    l3 is then overridden with U(-0.003, 0.003).
    Weights are stored as (in_features, out_features).
    """
    in_dim = s_dim + a_dim
    k1w, k1b, k2w, k2b, k3w, k3b = jax.random.split(key, 6)

    def lin(kw, kb, fan_in, fan_out, bound=None):
        if bound is None:
            bound = 1.0 / jnp.sqrt(fan_in)
        w = jax.random.uniform(kw, (fan_in, fan_out), jnp.float32, -bound, bound)
        b = jax.random.uniform(kb, (fan_out,), jnp.float32, -bound, bound)
        return w, b

    w1, b1 = lin(k1w, k1b, in_dim, hidden)
    w2, b2 = lin(k2w, k2b, hidden, hidden)
    w3, b3 = lin(k3w, k3b, hidden, 1, bound=0.003)
    return (w1, b1, w2, b2, w3, b3)


def reference_forward_bf16(s, a, params):
    """Pure-JAX reference mirroring the kernel's bf16-operand / f32-accum math."""
    w1, b1, w2, b2, w3, b3 = params
    x = jnp.concatenate([s, a], axis=1).astype(jnp.bfloat16)
    h1 = jnp.maximum(
        jnp.dot(x, w1.astype(jnp.bfloat16),
                preferred_element_type=jnp.float32) + b1, 0.0)
    h2 = jnp.maximum(
        jnp.dot(h1.astype(jnp.bfloat16), w2.astype(jnp.bfloat16),
                preferred_element_type=jnp.float32) + b2, 0.0)
    return h2 @ w3 + b3


def reference_forward_f32(s, a, params):
    """Pure-f32 reference (exact PyTorch semantics) for a loose sanity check."""
    w1, b1, w2, b2, w3, b3 = params
    x = jnp.concatenate([s, a], axis=1)
    x = jnp.maximum(x @ w1 + b1, 0.0)
    x = jnp.maximum(x @ w2 + b2, 0.0)
    return x @ w3 + b3


if __name__ == "__main__":
    key = jax.random.PRNGKey(0)
    k_params, k_s, k_a = jax.random.split(key, 3)

    batch, s_dim, a_dim = 8, 16, 8
    params = init_params(k_params, s_dim, a_dim)

    s = jax.random.normal(k_s, (batch, s_dim), jnp.float32)
    a = jax.random.normal(k_a, (batch, a_dim), jnp.float32)

    q = q_value_net_forward(s, a, params)
    q = jax.block_until_ready(q)

    q_ref = reference_forward_bf16(s, a, params)
    q_f32 = reference_forward_f32(s, a, params)

    assert q.shape == (batch, 1), q.shape
    # Tight check against the bf16-matched reference (validates tiling/plumbing).
    assert jnp.allclose(q, q_ref, atol=1e-3, rtol=1e-3), (q, q_ref)
    # Loose check against the exact f32 module semantics (bf16 rounding only).
    assert jnp.allclose(q, q_f32, atol=5e-2, rtol=5e-2), (q, q_f32)

    print("KERNEL_OK")
</pallas_src>

<mosaic_0001>
module attributes {stable_mosaic.version = 11 : i64} {
  func.func @_qnet_kernel(%arg0: i32, %arg1: memref<16x24xbf16, #tpu.memory_space<vmem>>, %arg2: memref<24x256xbf16, #tpu.memory_space<vmem>>, %arg3: memref<1x256xf32, #tpu.memory_space<vmem>>, %arg4: memref<256x256xbf16, #tpu.memory_space<vmem>>, %arg5: memref<1x256xf32, #tpu.memory_space<vmem>>, %arg6: memref<1x256xf32, #tpu.memory_space<vmem>>, %arg7: memref<1x1xf32, #tpu.memory_space<vmem>>, %arg8: memref<16x1xf32, #tpu.memory_space<vmem>>) attributes {dimension_semantics = [#tpu.dimension_semantics<parallel>], iteration_bounds = array<i64: 1>, scalar_prefetch = 0 : i64, scratch_operands = 0 : i64, tpu.core_type = #tpu.core_type<tc>, window_params = [{transform_indices = @transform_0, window_bounds = array<i64: 16, 24>}, {pipeline_mode = #tpu.pipeline_mode<synchronous>, transform_indices = @transform_1, window_bounds = array<i64: 24, 256>}, {pipeline_mode = #tpu.pipeline_mode<synchronous>, transform_indices = @transform_2, window_bounds = array<i64: 1, 256>}, {pipeline_mode = #tpu.pipeline_mode<synchronous>, transform_indices = @transform_3, window_bounds = array<i64: 256, 256>}, {pipeline_mode = #tpu.pipeline_mode<synchronous>, transform_indices = @transform_4, window_bounds = array<i64: 1, 256>}, {pipeline_mode = #tpu.pipeline_mode<synchronous>, transform_indices = @transform_5, window_bounds = array<i64: 1, 256>}, {pipeline_mode = #tpu.pipeline_mode<synchronous>, transform_indices = @transform_6, window_bounds = array<i64: 1, 1>}, {transform_indices = @transform_7, window_bounds = array<i64: 16, 1>}]} {
    %c0 = arith.constant 0 : index
    %c0_0 = arith.constant 0 : index
    %0 = vector.load %arg1[%c0, %c0_0] : memref<16x24xbf16, #tpu.memory_space<vmem>>, vector<16x24xbf16>
    %c0_1 = arith.constant 0 : index
    %c0_2 = arith.constant 0 : index
    %1 = vector.load %arg2[%c0_1, %c0_2] : memref<24x256xbf16, #tpu.memory_space<vmem>>, vector<24x256xbf16>
    %cst = arith.constant dense<0.000000e+00> : vector<16x256xf32>
    %2 = tpu.matmul %0, %1, %cst {dimension_numbers = #tpu.dot_dimension_numbers<[1], [0], [0], [1], [0, 0, 1, 1], [], []>} : vector<16x24xbf16>, vector<24x256xbf16>, vector<16x256xf32> -> vector<16x256xf32>
    %c0_3 = arith.constant 0 : index
    %c0_4 = arith.constant 0 : index
    %3 = vector.load %arg3[%c0_3, %c0_4] : memref<1x256xf32, #tpu.memory_space<vmem>>, vector<1x256xf32>
    %4 = vector.broadcast %3 : vector<1x256xf32> to vector<16x256xf32>
    %5 = arith.addf %2, %4 : vector<16x256xf32>
    %cst_5 = arith.constant 0.000000e+00 : f32
    %6 = vector.broadcast %cst_5 : f32 to vector<16x256xf32>
    %7 = arith.maximumf %5, %6 : vector<16x256xf32>
    %8 = arith.truncf %7 : vector<16x256xf32> to vector<16x256xbf16>
    %c0_6 = arith.constant 0 : index
    %c0_7 = arith.constant 0 : index
    %9 = vector.load %arg4[%c0_6, %c0_7] : memref<256x256xbf16, #tpu.memory_space<vmem>>, vector<256x256xbf16>
    %cst_8 = arith.constant dense<0.000000e+00> : vector<16x256xf32>
    %10 = tpu.matmul %8, %9, %cst_8 {dimension_numbers = #tpu.dot_dimension_numbers<[1], [0], [0], [1], [0, 0, 1, 1], [], []>} : vector<16x256xbf16>, vector<256x256xbf16>, vector<16x256xf32> -> vector<16x256xf32>
    %c0_9 = arith.constant 0 : index
    %c0_10 = arith.constant 0 : index
    %11 = vector.load %arg5[%c0_9, %c0_10] : memref<1x256xf32, #tpu.memory_space<vmem>>, vector<1x256xf32>
    %12 = vector.broadcast %11 : vector<1x256xf32> to vector<16x256xf32>
    %13 = arith.addf %10, %12 : vector<16x256xf32>
    %cst_11 = arith.constant 0.000000e+00 : f32
    %14 = vector.broadcast %cst_11 : f32 to vector<16x256xf32>
    %15 = arith.maximumf %13, %14 : vector<16x256xf32>
    %c0_12 = arith.constant 0 : index
    %c0_13 = arith.constant 0 : index
    %16 = vector.load %arg6[%c0_12, %c0_13] : memref<1x256xf32, #tpu.memory_space<vmem>>, vector<1x256xf32>
    %17 = vector.broadcast %16 : vector<1x256xf32> to vector<16x256xf32>
    %18 = arith.mulf %15, %17 : vector<16x256xf32>
    %cst_14 = arith.constant dense<0.000000e+00> : vector<16xf32>
    %19 = vector.multi_reduction <add>, %18, %cst_14 [1] : vector<16x256xf32> to vector<16xf32>
    %20 = vector.shape_cast %19 : vector<16xf32> to vector<16x1xf32>
    %c0_15 = arith.constant 0 : index
    %c0_16 = arith.constant 0 : index
    %21 = vector.load %arg7[%c0_15, %c0_16] : memref<1x1xf32, #tpu.memory_space<vmem>>, vector<1x1xf32>
    %22 = vector.broadcast %21 : vector<1x1xf32> to vector<16x1xf32>
    %23 = arith.addf %20, %22 : vector<16x1xf32>
    %c0_17 = arith.constant 0 : index
    %c0_18 = arith.constant 0 : index
    %24 = vector.load %arg8[%c0_17, %c0_18] : memref<16x1xf32, #tpu.memory_space<vmem>>, vector<16x1xf32>
    tpu.vector_store %arg8[%c0_17, %c0_18], %23 {strides = array<i32>} : memref<16x1xf32, #tpu.memory_space<vmem>>, vector<16x1xf32>,
    return
  }
  func.func @transform_0(%arg0: i32) -> (i32, i32) {
    %c0_i32 = arith.constant 0 : i32
    %c0_i32_0 = arith.constant 0 : i32
    return %arg0, %c0_i32 : i32, i32
  }
  func.func @transform_1(%arg0: i32) -> (i32, i32) {
    %c0_i32 = arith.constant 0 : i32
    %c0_i32_0 = arith.constant 0 : i32
    %c0_i32_1 = arith.constant 0 : i32
    return %c0_i32, %c0_i32_0 : i32, i32
  }
  func.func @transform_2(%arg0: i32) -> (i32, i32) {
    %c0_i32 = arith.constant 0 : i32
    %c0_i32_0 = arith.constant 0 : i32
    %c0_i32_1 = arith.constant 0 : i32
    return %c0_i32, %c0_i32_0 : i32, i32
  }
  func.func @transform_3(%arg0: i32) -> (i32, i32) {
    %c0_i32 = arith.constant 0 : i32
    %c0_i32_0 = arith.constant 0 : i32
    %c0_i32_1 = arith.constant 0 : i32
    return %c0_i32, %c0_i32_0 : i32, i32
  }
  func.func @transform_4(%arg0: i32) -> (i32, i32) {
    %c0_i32 = arith.constant 0 : i32
    %c0_i32_0 = arith.constant 0 : i32
    %c0_i32_1 = arith.constant 0 : i32
    return %c0_i32, %c0_i32_0 : i32, i32
  }
  func.func @transform_5(%arg0: i32) -> (i32, i32) {
    %c0_i32 = arith.constant 0 : i32
    %c0_i32_0 = arith.constant 0 : i32
    %c0_i32_1 = arith.constant 0 : i32
    return %c0_i32, %c0_i32_0 : i32, i32
  }
  func.func @transform_6(%arg0: i32) -> (i32, i32) {
    %c0_i32 = arith.constant 0 : i32
    %c0_i32_0 = arith.constant 0 : i32
    %c0_i32_1 = arith.constant 0 : i32
    return %c0_i32, %c0_i32_0 : i32, i32
  }
  func.func @transform_7(%arg0: i32) -> (i32, i32) {
    %c0_i32 = arith.constant 0 : i32
    %c0_i32_0 = arith.constant 0 : i32
    return %arg0, %c0_i32 : i32, i32
  }
}

</mosaic_0001>

<bundles_post_ra>
// kernel: tpu_custom_call.1
= control target key start
LH: loop header
LB: loop body
LE: loop exit
PB: predicated region body
PF: predicated region fallthrough
CT: control target
= control target key end

     0   :  { %s738_s0 = inlined_call_operand.hbm [shape: bf16[16,24], index: 0, kind: input, shape index: {}]   ;;  %s739_s1 = inlined_call_operand.hbm [shape: bf16[24,256], index: 1, kind: input, shape index: {}]   ;;  %s740_s2 = inlined_call_operand.vmem [shape: f32[1,256], index: 2, kind: input, shape index: {}]   ;;  %s741_s3 = inlined_call_operand.hbm [shape: bf16[256,256], index: 3, kind: input, shape index: {}]   ;;  %s742_s4 = inlined_call_operand.vmem [shape: f32[1,256], index: 4, kind: input, shape index: {}]   ;;  %s743_s5 = inlined_call_operand.vmem [shape: f32[1,256], index: 5, kind: input, shape index: {}]   ;;  %s744_s6 = inlined_call_operand.<no memory space> [shape: f32[1,1], index: 6, kind: input, shape index: {}]   ;;  %s745_s7 = inlined_call_operand.vmem [shape: f32[16,1], index: 7, kind: output, shape index: {}]  }
   0x1   :  { %v12_v0 = vstv %s744_s6 }
   0x2   :  { %13 = vst [vmem:[#allocation2] sm:$0x1] %v12_v0 }
   0x3   :  { %14 = vsyncpa [#allocation4], 0 }
   0x4   :  { %15 = vsyncpa [#allocation6], 0  ;;  %s630_s26 = smov [#allocation5]   ;;  %s560_s30 = scalar_lea.hbm %s739_s1, 384 }
   0x5   :  { %s33_s27 = sshll.u32 %s630_s26, 4  ;;  %p561_p0 = scmp.ne.s32.totalorder %s739_s1, %s560_s30  ;;  %s34_s27 = int_to_ptr.vmem [resolvable:$true] %s33_s27 }
   0x6   :  { %p564_p1 = scmp.lt.u32.totalorder %s560_s30, %s739_s1 }
   0x8   :  { %p566_p2 = pnand %p564_p1, %p561_p0 }
   0xa   :  { %569 = shalt.err (!%p566_p2)
}
   0xb   :  { %s570_s6 = scalar_lea.vmem %s34_s27, 384  ;;  %p575_p4 = scmp.lt.s32.totalorder %s34_s27, %s34_s27 }
   0xc   :  { %p571_p3 = scmp.ne.s32.totalorder %s34_s27, %s570_s6  ;;  %p576_p5 = scmp.lt.s32.totalorder %s570_s6, %s570_s6 }
   0xe   :  { %p577_p6 = por %p576_p5, %p575_p4 }
  0x10   :  { %p578_p7 = pnand %p577_p6, %p571_p3 }
  0x12   :  { %581 = shalt.err (!%p578_p7)
}
  0x13   :  { %s631_s12 = smov 128   ;;  %s632_s13 = smov 8  }
  0x14   :  { %39 = dma.hbm_to_vmem [thread:$0]  %s739_s1, 384, %s34_s27, [#allocation6], %s631_s12, %s631_s12, %s632_s13  }
  0x15   :  { %s633_s16 = smov [#allocation3]   ;;  %s582_s20 = scalar_lea.hbm %s738_s0, 128 }
  0x16   :  { %s21_s17 = sshll.u32 %s633_s16, 4  ;;  %p583_p8 = scmp.ne.s32.totalorder %s738_s0, %s582_s20  ;;  %s22_s17 = int_to_ptr.vmem [resolvable:$true] %s21_s17 }
  0x17   :  { %p586_p9 = scmp.lt.u32.totalorder %s582_s20, %s738_s0 }
  0x19   :  { %p588_p10 = pnand %p586_p9, %p583_p8 }
  0x1b   :  { %591 = shalt.err (!%p588_p10)
}
  0x1c   :  { %s592_s25 = scalar_lea.vmem %s22_s17, 128  ;;  %p597_p12 = scmp.lt.s32.totalorder %s22_s17, %s22_s17 }
  0x1d   :  { %p593_p11 = scmp.ne.s32.totalorder %s22_s17, %s592_s25  ;;  %p598_p13 = scmp.lt.s32.totalorder %s592_s25, %s592_s25 }
  0x1f   :  { %p599_p0 = por %p598_p13, %p597_p12 }
  0x21   :  { %p600_p1 = pnand %p599_p0, %p593_p11 }
  0x23   :  { %603 = shalt.err (!%p600_p1)
}
  0x24   :  { %s634_s1 = smov 64   ;;  %s635_s26 = smov 4  }
  0x25   :  { %27 = dma.hbm_to_vmem [thread:$0]  %s738_s0, 128, %s22_s17, [#allocation4], %s634_s1, %s634_s1, %s635_s26  }
  0x26   :  { %s636_s29 = smov [#allocation7]   ;;  %s604_s10 = scalar_lea.hbm %s741_s3, 4096 }
  0x27   :  { %s47_s30 = sshll.u32 %s636_s29, 4  ;;  %p605_p2 = scmp.ne.s32.totalorder %s741_s3, %s604_s10  ;;  %s48_s30 = int_to_ptr.vmem [resolvable:$true] %s47_s30 }
  0x28   :  { %p608_p3 = scmp.lt.u32.totalorder %s604_s10, %s741_s3 }
  0x2a   :  { %p610_p4 = pnand %p608_p3, %p605_p2 }
  0x2c   :  { %613 = shalt.err (!%p610_p4)
}
  0x2d   :  { %s614_s16 = scalar_lea.vmem %s48_s30, 4096  ;;  %p619_p6 = scmp.lt.s32.totalorder %s48_s30, %s48_s30 }
  0x2e   :  { %p615_p5 = scmp.ne.s32.totalorder %s48_s30, %s614_s16  ;;  %p620_p7 = scmp.lt.s32.totalorder %s614_s16, %s614_s16 }
  0x30   :  { %p621_p8 = por %p620_p7, %p619_p6 }
  0x32   :  { %p622_p9 = pnand %p621_p8, %p615_p5 }
  0x34   :  { %625 = shalt.err (!%p622_p9)
}
  0x35   :  { %53 = dma.hbm_to_vmem [thread:$0]  %s741_s3, 4096, %s48_s30, [#allocation6], %s631_s12, %s631_s12, %s632_s13  }
  0x36   :  { %626 = dma.done.wait [#allocation4], 128  }
  0x37   :  { %627 = vsyncadd [#allocation4], 4294967168 }
  0x38   :  { %628 = dma.done.wait [#allocation6], 4480  }
  0x39   :  { %629 = vsyncadd [#allocation6], 4294962816  ;;  %v637_v1 = vmov 0   ;;  %v506_v2 = vld [vmem:[#allocation5 + $0x4] ss:$8 sps:$4 sm:$0xff]   ;;  %v74_v4 = vld [vmem:[#allocation5 + $0x10] sm:$0xff]  ;;  %v77_v41 = vlaneseq }
  0x3a   :  { %150 = vmatprep.mubr.bf16.mxu0 %v637_v1  ;;  %v508_v3 = vld [vmem:[#allocation5] ss:$8 sps:$4 sm:$0xff]   ;;  %vm111_vm0 = vcmask 1043456   ;;  %118 = vmatprep.subr.bf16.mxu0 %v506_v2  ;;  %v462_v5 = vcombine.high %v74_v4, %v74_v4  ;;  %v461_v6 = vcombine.low %v74_v4, %v74_v4  ;;  %v512_v7 = vld [vmem:[#allocation7 + $0x4] ss:$8 sps:$4 sm:$0xff]   ;;  %vm107_vm1 = vcmask 195584  }
  0x3b   :  { %119 = vmatpush1.bf16.msra.mxu0 %v508_v3  ;;  %v514_v8 = vld [vmem:[#allocation7] ss:$8 sps:$4 sm:$0xff]   ;;  %v515_v10 = vld [vmem:[#allocation7 + $0x14] ss:$8 sps:$4 sm:$0xff]   ;;  %371 = vmatprep.subr.bf16.mxu1 %v512_v7  ;;  %v517_v12 = vld [vmem:[#allocation7 + $0x10] ss:$8 sps:$4 sm:$0xff]  }
  0x3c   :  { %463 = vmatprep.subr.msk.bf16.mxu0 %vm111_vm0, %v462_v5  ;;  %v113_v9 = vsel %vm111_vm0, %v461_v6, 0  ;;  %v511_v11 = vld [vmem:[#allocation3] sm:$0xff]   ;;  %372 = vmatpush1.bf16.msra.mxu1 %v514_v8  ;;  %v521_v15 = vld [vmem:[#allocation7 + $0x34] ss:$8 sps:$4 sm:$0xff]   ;;  %v523_v16 = vld [vmem:[#allocation7 + $0x30] ss:$8 sps:$4 sm:$0xff]  }
  0x3d   :  { %373 = vmatprep.subr.bf16.mxu1 %v515_v10  ;;  %v518_v13 = vld [vmem:[#allocation7 + $0x24] ss:$8 sps:$4 sm:$0xff]   ;;  %v520_v14 = vld [vmem:[#allocation7 + $0x20] ss:$8 sps:$4 sm:$0xff]   ;;  %v527_v19 = vld [vmem:[#allocation7 + $0x54] ss:$8 sps:$4 sm:$0xff]  }
  0x3e   :  { %v524_v17 = vld [vmem:[#allocation7 + $0x44] ss:$8 sps:$4 sm:$0xff]   ;;  %v526_v18 = vld [vmem:[#allocation7 + $0x40] ss:$8 sps:$4 sm:$0xff]   ;;  %v529_v20 = vld [vmem:[#allocation7 + $0x50] ss:$8 sps:$4 sm:$0xff]  }
  0x3f   :  { %121 = vmatpush1.bf16.msra.mxu0 %v113_v9  ;;  %v530_v21 = vld [vmem:[#allocation7 + $0x64] ss:$8 sps:$4 sm:$0xff]   ;;  %v532_v22 = vld [vmem:[#allocation7 + $0x60] ss:$8 sps:$4 sm:$0xff]   ;;  %v533_v23 = vld [vmem:[#allocation7 + $0x74] ss:$8 sps:$4 sm:$0xff]  }
  0x40   :  { %374 = vmatpush1.bf16.msra.mxu1 %v517_v12  ;;  %v535_v24 = vld [vmem:[#allocation7 + $0x70] ss:$8 sps:$4 sm:$0xff]   ;;  %v536_v25 = vld [vmem:[#allocation7 + $0x84] ss:$8 sps:$4 sm:$0xff]   ;;  %v538_v26 = vld [vmem:[#allocation7 + $0x80] ss:$8 sps:$4 sm:$0xff]  }
  0x41   :  { %375 = vmatprep.subr.bf16.mxu1 %v518_v13  ;;  %v539_v27 = vld [vmem:[#allocation7 + $0x94] ss:$8 sps:$4 sm:$0xff]   ;;  %v541_v28 = vld [vmem:[#allocation7 + $0x90] ss:$8 sps:$4 sm:$0xff]   ;;  %v542_v29 = vld [vmem:[#allocation7 + $0xa4] ss:$8 sps:$4 sm:$0xff]  }
  0x42   :  { %464 = vmatmul.mubr.msk.bf16.vlgmr.msra.gmra.mrb[0].mxu0 %vm107_vm1, %v511_v11  ;;  %v544_v30 = vld [vmem:[#allocation7 + $0xa0] ss:$8 sps:$4 sm:$0xff]   ;;  %v545_v31 = vld [vmem:[#allocation7 + $0xb4] ss:$8 sps:$4 sm:$0xff]   ;;  %v547_v32 = vld [vmem:[#allocation7 + $0xb0] ss:$8 sps:$4 sm:$0xff]  }
  0x43   :  { %v548_v33 = vld [vmem:[#allocation7 + $0xc4] ss:$8 sps:$4 sm:$0xff]   ;;  %v550_v34 = vld [vmem:[#allocation7 + $0xc0] ss:$8 sps:$4 sm:$0xff]   ;;  %v551_v35 = vld [vmem:[#allocation7 + $0xd4] ss:$8 sps:$4 sm:$0xff]  }
  0x44   :  { %376 = vmatpush1.bf16.msra.mxu1 %v520_v14  ;;  %v553_v36 = vld [vmem:[#allocation7 + $0xd0] ss:$8 sps:$4 sm:$0xff]   ;;  %v554_v37 = vld [vmem:[#allocation7 + $0xe4] ss:$8 sps:$4 sm:$0xff]   ;;  %v556_v38 = vld [vmem:[#allocation7 + $0xe0] ss:$8 sps:$4 sm:$0xff]  }
  0x45   :  { %377 = vmatprep.subr.bf16.mxu1 %v521_v15  ;;  %v557_v39 = vld [vmem:[#allocation7 + $0xf4] ss:$8 sps:$4 sm:$0xff]   ;;  %v559_v40 = vld [vmem:[#allocation7 + $0xf0] ss:$8 sps:$4 sm:$0xff]   ;;  %v78_v42 = vshrl.u32 %v77_v41, 7  ;;  %vm449_vm2 = vcmask 7168  }
  0x46   :  { %v75_v44 = vld [vmem:[%s740_s2] sm:$0x3] }
  0x47   :  { %v79_v43 = vsub.s32 0, %v78_v42  ;;  %v83_v45 = vsub.s32 1, %v78_v42  ;;  %v199_v62 = vld [vmem:[%s742_s4] sm:$0x3] }
  0x48   :  { %378 = vmatpush1.bf16.msra.mxu1 %v523_v16  ;;  %v418_v1 = vld [vmem:[%s743_s5] sm:$0x3] }
  0x49   :  { %379 = vmatprep.subr.bf16.mxu1 %v524_v17  ;;  %v80_v46 = vrot.slane %v75_v44, %v79_v43  ;;  %v84_v47 = vrot.slane %v75_v44, %v83_v45  ;;  %v204_v63 = vrot.slane %v199_v62, %v79_v43  ;;  %v208_v0 = vrot.slane %v199_v62, %v83_v45 }
  0x4a   :  { %v423_v5 = vrot.slane %v418_v1, %v79_v43  ;;  %v427_v8 = vrot.slane %v418_v1, %v83_v45 }
  0x4c   :  { %380 = vmatpush1.bf16.msra.mxu1 %v526_v18 }
  0x4d   :  { %381 = vmatprep.subr.bf16.mxu1 %v527_v19 }
  0x50   :  { %382 = vmatpush1.bf16.msra.mxu1 %v529_v20 }
  0x51   :  { %383 = vmatprep.subr.bf16.mxu1 %v530_v21 }
  0x54   :  { %384 = vmatpush1.bf16.msra.mxu1 %v532_v22  ;;  %v497_v22 = vld [vmem:[#allocation2] ss:$0 sm:$0xff] }
  0x55   :  { %385 = vmatprep.subr.bf16.mxu1 %v533_v23 }
  0x58   :  { %386 = vmatpush1.bf16.msra.mxu1 %v535_v24 }
  0x59   :  { %387 = vmatprep.subr.bf16.mxu1 %v536_v25 }
  0x5c   :  { %388 = vmatpush1.bf16.msra.mxu1 %v538_v26 }
  0x5d   :  { %389 = vmatprep.subr.bf16.mxu1 %v539_v27 }
  0x60   :  { %390 = vmatpush1.bf16.msra.mxu1 %v541_v28 }
  0x61   :  { %391 = vmatprep.subr.bf16.mxu1 %v542_v29 }
  0x64   :  { %392 = vmatpush1.bf16.msra.mxu1 %v544_v30 }
  0x65   :  { %393 = vmatprep.subr.bf16.mxu1 %v545_v31 }
  0x68   :  { %394 = vmatpush1.bf16.msra.mxu1 %v547_v32 }
  0x69   :  { %395 = vmatprep.subr.bf16.mxu1 %v548_v33 }
  0x6c   :  { %396 = vmatpush1.bf16.msra.mxu1 %v550_v34 }
  0x6d   :  { %397 = vmatprep.subr.bf16.mxu1 %v551_v35 }
  0x70   :  { %398 = vmatpush1.bf16.msra.mxu1 %v553_v36 }
  0x71   :  { %399 = vmatprep.subr.bf16.mxu1 %v554_v37 }
  0x74   :  { %400 = vmatpush1.bf16.msra.mxu1 %v556_v38 }
  0x75   :  { %401 = vmatprep.subr.bf16.mxu1 %v557_v39 }
  0x78   :  { %402 = vmatpush1.bf16.msra.mxu1 %v559_v40 }
 0x115   :  { %v152_v48 = vpop.f32.mrb[0].mxu0 }
 0x116   :  { %v153_v49 = vadd.f32 %v152_v48, %v80_v46  ;;  %v154_v50 = vpop.f32.mrb[1].mxu0 }
 0x117   :  { %v155_v51 = vadd.f32 %v154_v50, %v84_v47  ;;  %v156_v52 = vpop.f32.mrb[2].mxu0 }
 0x118   :  { %v157_v53 = vadd.f32 %v156_v52, %v80_v46  ;;  %v158_v54 = vpop.f32.mrb[3].mxu0  ;;  %v161_v56 = vmax.f32 %v153_v49, 0.0 }
 0x119   :  { %v159_v55 = vadd.f32 %v158_v54, %v84_v47  ;;  %v162_v58 = vmax.f32 %v155_v51, 0.0 }
 0x11a   :  { %v163_v57 = vmax.f32 %v157_v53, 0.0 }
 0x11b   :  { %v164_v59 = vmax.f32 %v159_v55, 0.0 }
 0x11c   :  { %v165_v60 = vpack.c.bf16 %v163_v57, %v161_v56 }
 0x11d   :  { %v166_v61 = vpack.c.bf16 %v164_v59, %v162_v58 }
 0x11f   :  { %403 = vmatprep.mubr.bf16.mxu1 %v166_v61 }
 0x120   :  { %404 = vmatmul.mubr.bf16.vlgmr.msra.gmra.mrb[0].mxu1 %v165_v60 }
 0x1f3   :  { %v405_v2 = vpop.f32.mrb[0].mxu1 }
 0x1f4   :  { %v406_v3 = vadd.f32 %v405_v2, %v204_v63  ;;  %v407_v4 = vpop.f32.mrb[1].mxu1 }
 0x1f5   :  { %v408_v6 = vadd.f32 %v407_v4, %v208_v0  ;;  %v409_v7 = vpop.f32.mrb[2].mxu1 }
 0x1f6   :  { %v414_v9 = vmax.f32 %v406_v3, 0.0  ;;  %v410_v10 = vadd.f32 %v409_v7, %v204_v63  ;;  %v411_v11 = vpop.f32.mrb[3].mxu1 }
 0x1f7   :  { %v415_v12 = vmax.f32 %v408_v6, 0.0  ;;  %v412_v13 = vadd.f32 %v411_v11, %v208_v0 }
 0x1f8   :  { %v416_v14 = vmax.f32 %v410_v10, 0.0  ;;  %v430_v15 = vmul.f32 %v423_v5, %v414_v9 }
 0x1f9   :  { %v417_v16 = vmax.f32 %v412_v13, 0.0  ;;  %v431_v17 = vmul.f32 %v427_v8, %v415_v12 }
 0x1fa   :  { %v432_v18 = vmul.f32 %v423_v5, %v416_v14 }
 0x1fb   :  { %v433_v19 = vmul.f32 %v427_v8, %v417_v16  ;;  %v434_v20 = vadd.f32 %v431_v17, %v430_v15 }
 0x1fd   :  { %435 = vadd.xlane.f32.xlu0 %v434_v20  ;;  %v437_v21 = vadd.f32 %v433_v19, %v432_v18 }
 0x201   :  { %438 = vadd.xlane.f32.xlu0 %v437_v21 }
 0x28a   :  { %v436_v23 = vpop.xlane.xlu0 %435 }
 0x28b   :  { %v447_v24 = vadd.f32 %v497_v22, %v436_v23 }
 0x28d   :  { %450 = vst.msk [vmem:[%s745_s7] sm:$0xff] %vm449_vm2, %v447_v24 }
 0x28e   :  { %v439_v25 = vpop.xlane.xlu0 %438 }
 0x28f   :  { %v448_v26 = vadd.f32 %v497_v22, %v439_v25 }
 0x291   :  { %451 = vst.msk [vmem:[%s745_s7 + $0x8] sm:$0xff] %vm449_vm2, %v448_v26 }
 0x292   :  { %456 = vsyncpa [#allocation4], 1 }
 0x293   :  { %457 = vsyncpa [#allocation6], 1 }

</bundles_post_ra>
